<compile_context>
chip_gen: v7x
topology: tpu7x:2x2x1
jax: 0.10.0
libtpu: 0.0.40
codegen_flags: <defaults>
</compile_context>

<pallas_src>
import math
import functools

import jax
import jax.numpy as jnp
from jax.experimental import pallas as pl
from jax.experimental.pallas import tpu as pltpu


def _mha_kernel(x_ref, w_ref, o_ref, *, num_heads, d_out):
    # x_ref: (Bb, T, d_in)           batch-row block
    # w_ref: (d_in, 3*H*d_out)       packed [Q heads | K heads | V heads]; scale folded into Q
    # o_ref: (Bb, T, H*d_out)        final-layout output slab (torch.cat(dim=-1) order)
    x = x_ref[...]                                   # (Bb, T, d_in)
    w = w_ref[...]                                   # (d_in, 3*H*d_out), x.dtype
    dt = x.dtype

    # One wide MXU pass for every head's (pre-scaled) Q, K and V projection.
    qkv = jnp.einsum("btd,df->btf", x, w,
                     preferred_element_type=jnp.float32)   # (Bb, T, 3*H*d_out) f32

    T = x.shape[1]
    # Causal mask: position i attends to j <= i (broadcast over the batch block).
    row = jax.lax.broadcasted_iota(jnp.int32, (T, T), 0)
    col = jax.lax.broadcasted_iota(jnp.int32, (T, T), 1)
    causal = (row >= col)[None]                       # (1, T, T)

    # Static unroll over heads (H is small); each head writes its output slice
    # immediately, so only one head's intermediates are live at a time.
    # TODO(synk): switch to lax.fori_loop + pl.ds(h*d_out, d_out) for large H.
    for h in range(num_heads):
        q = qkv[:, :, (0 * num_heads + h) * d_out:(0 * num_heads + h + 1) * d_out].astype(dt)
        k = qkv[:, :, (1 * num_heads + h) * d_out:(1 * num_heads + h + 1) * d_out].astype(dt)
        v = qkv[:, :, (2 * num_heads + h) * d_out:(2 * num_heads + h + 1) * d_out].astype(dt)

        # scores[b, i, j] = <q_i, k_j> (scale already folded into q's weights).
        scores = jnp.einsum("bqd,bkd->bqk", q, k,
                            preferred_element_type=jnp.float32)    # (Bb, T, T) f32
        scores = jnp.where(causal, scores, -jnp.inf)

        # Numerically-stable softmax; every row has >=1 unmasked entry (the diagonal).
        m = jnp.max(scores, axis=-1, keepdims=True)
        e = jnp.exp(scores - m)
        denom = jnp.sum(e, axis=-1, keepdims=True)
        attn = e * pl.reciprocal(denom, approx=True)               # EUP slot, ~free

        ctx = jnp.einsum("bqk,bkd->bqd", attn.astype(dt), v,
                         preferred_element_type=jnp.float32)       # (Bb, T, d_out)

        # Store this head's slice of the final layout directly.
        o_ref[:, :, h * d_out:(h + 1) * d_out] = ctx.astype(o_ref.dtype)


def _vmem_budget(block_b, T, d_in, H, d_out, itemsize):
    """Rough VMEM footprint (bytes) for one grid step, with headroom."""
    f32 = 4
    x_blk = 2 * block_b * T * d_in * itemsize             # double-buffered input
    w_blk = 2 * d_in * 3 * H * d_out * itemsize           # resident weight (2 bufs today)
    o_blk = 2 * block_b * T * H * d_out * itemsize        # double-buffered output
    interm = block_b * T * 3 * H * d_out * f32             # qkv accumulator
    interm += 3 * block_b * T * T * f32                    # scores / exp / attn (one head)
    interm += 4 * block_b * T * d_out * f32                # q, k, v, ctx (one head)
    est = x_blk + w_blk + o_blk + interm
    # Generous headroom; clamp to a range that is safe on v5e(16 MiB scoped default),
    # v6e(128 MiB physical) and v7x(64 MiB physical).
    return int(min(max(4 * est, 16 * 1024 * 1024), 32 * 1024 * 1024))


def multi_head_attention(x, wq, wk, wv, *, block_b=1):
    """x: (B, T, d_in); wq/wk/wv: (H, d_in, d_out).  Returns (B, T, H*d_out)."""
    B, T, d_in = x.shape
    H, _, d_out = wq.shape
    assert B % block_b == 0, (B, block_b)

    # Fold the softmax scale into the Q projection and pack all projections into a
    # single (d_in, 3*H*d_out) weight, column order [Q h0..H-1 | K h0..H-1 | V h0..H-1].
    scale = 1.0 / math.sqrt(d_out)
    w_qkv = jnp.stack([wq * scale, wk, wv], axis=0)             # (3, H, d_in, d_out)
    w_qkv = jnp.transpose(w_qkv, (2, 0, 1, 3)).reshape(d_in, 3 * H * d_out)
    w_qkv = w_qkv.astype(x.dtype)                               # bf16 path / half VMEM when x is bf16

    kernel = functools.partial(_mha_kernel, num_heads=H, d_out=d_out)
    vmem_bytes = _vmem_budget(block_b, T, d_in, H, d_out, jnp.dtype(x.dtype).itemsize)

    return pl.pallas_call(
        kernel,
        out_shape=jax.ShapeDtypeStruct((B, T, H * d_out), x.dtype),
        grid_spec=pltpu.PrefetchScalarGridSpec(
            num_scalar_prefetch=0,
            grid=(B // block_b,),
            in_specs=[
                # x: one batch-row block per grid step.
                pl.BlockSpec((block_b, T, d_in), lambda b: (b, 0, 0)),
                # Packed QKV weights: constant index_map -> VMEM-resident across steps.
                pl.BlockSpec((d_in, 3 * H * d_out), lambda b: (0, 0)),
            ],
            out_specs=pl.BlockSpec((block_b, T, H * d_out), lambda b: (b, 0, 0)),
        ),
        compiler_params=pltpu.CompilerParams(
            dimension_semantics=("parallel",),
            vmem_limit_bytes=vmem_bytes,
        ),
    )(x, w_qkv)


def reference(x, wq, wk, wv):
    """Pure-JAX reference of MultiHeadAttentionWrapper (eval mode)."""
    B, T, d_in = x.shape
    H, _, d_out = wq.shape
    outs = []
    for h in range(H):
        q = x @ wq[h]
        k = x @ wk[h]
        v = x @ wv[h]
        scores = jnp.einsum("btd,bsd->bts", q, k) / math.sqrt(d_out)
        mask = jnp.triu(jnp.ones((T, T), bool), k=1)
        scores = jnp.where(mask[None], -jnp.inf, scores)
        w = jax.nn.softmax(scores, axis=-1)
        outs.append(jnp.einsum("bts,bsd->btd", w, v))
    return jnp.concatenate(outs, axis=-1)


if __name__ == "__main__":
    # Shapes implied by the module's surrounding script:
    # inputs: (6, 3), batch = stack of 2 -> (2, 6, 3); d_in=3, d_out=4,
    # context_length=6, num_heads=2, dropout=0.5 (eval mode -> identity).
    inputs = jnp.array(
        [[0.43, 0.15, 0.89],
         [0.55, 0.87, 0.66],
         [0.57, 0.85, 0.64],
         [0.22, 0.58, 0.33],
         [0.77, 0.25, 0.10],
         [0.05, 0.80, 0.55]], dtype=jnp.float32)
    x = jnp.stack([inputs, inputs], axis=0)          # (2, 6, 3)

    d_in, d_out, num_heads = 3, 4, 2
    key = jax.random.PRNGKey(0)
    kq, kk, kv = jax.random.split(key, 3)
    bound = 1.0 / math.sqrt(d_in)                    # nn.Linear default uniform init
    wq = jax.random.uniform(kq, (num_heads, d_in, d_out), jnp.float32, -bound, bound)
    wk = jax.random.uniform(kk, (num_heads, d_in, d_out), jnp.float32, -bound, bound)
    wv = jax.random.uniform(kv, (num_heads, d_in, d_out), jnp.float32, -bound, bound)

    out = multi_head_attention(x, wq, wk, wv)
    out = jax.block_until_ready(out)

    ref = reference(x, wq, wk, wv)
    assert out.shape == (2, 6, num_heads * d_out), out.shape
    # Tolerance accounts for the approximate (EUP) reciprocal in the softmax.
    assert jnp.allclose(out, ref, atol=5e-3, rtol=5e-3), float(jnp.max(jnp.abs(out - ref)))

    print("KERNEL_OK")
</pallas_src>

<mosaic_0001>
module attributes {stable_mosaic.version = 11 : i64} {
  func.func @_mha_kernel(%arg0: i32, %arg1: memref<1x6x3xf32, #tpu.memory_space<vmem>>, %arg2: memref<3x24xf32, #tpu.memory_space<vmem>>, %arg3: memref<1x6x8xf32, #tpu.memory_space<vmem>>) attributes {dimension_semantics = [#tpu.dimension_semantics<parallel>], iteration_bounds = array<i64: 2>, scalar_prefetch = 0 : i64, scratch_operands = 0 : i64, tpu.core_type = #tpu.core_type<tc>, window_params = [{transform_indices = @transform_0, window_bounds = array<i64: 1, 6, 3>}, {pipeline_mode = #tpu.pipeline_mode<synchronous>, transform_indices = @transform_1, window_bounds = array<i64: 3, 24>}, {transform_indices = @transform_2, window_bounds = array<i64: 1, 6, 8>}]} {
    %c0 = arith.constant 0 : index
    %c0_0 = arith.constant 0 : index
    %c0_1 = arith.constant 0 : index
    %0 = vector.load %arg1[%c0, %c0_0, %c0_1] : memref<1x6x3xf32, #tpu.memory_space<vmem>>, vector<1x6x3xf32>
    %c0_2 = arith.constant 0 : index
    %c0_3 = arith.constant 0 : index
    %1 = vector.load %arg2[%c0_2, %c0_3] : memref<3x24xf32, #tpu.memory_space<vmem>>, vector<3x24xf32>
    "tpu.trace_start"() <{level = 10 : i32, message = "btd,df->btf"}> : () -> ()
    %cst = arith.constant dense<0.000000e+00> : vector<1x6x24xf32>
    %2 = tpu.matmul %0, %1, %cst {dimension_numbers = #tpu.dot_dimension_numbers<[2], [0], [0, 1], [1], [0, 0, 0, 1, 1, 1], [], []>} : vector<1x6x3xf32>, vector<3x24xf32>, vector<1x6x24xf32> -> vector<1x6x24xf32>
    "tpu.trace_stop"() : () -> ()
    %3 = tpu.iota {dimensions = array<i32: 0>} : vector<6x6xi32>
    %4 = tpu.iota {dimensions = array<i32: 1>} : vector<6x6xi32>
    %5 = arith.cmpi sge, %3, %4 : vector<6x6xi32>
    %6 = vector.shape_cast %5 : vector<6x6xi1> to vector<1x6x6xi1>
    %7 = vector.extract_strided_slice %2 {offsets = [0, 0, 0], sizes = [1, 6, 4], strides = [1, 1, 1]} : vector<1x6x24xf32> to vector<1x6x4xf32>
    %8 = vector.extract_strided_slice %2 {offsets = [0, 0, 8], sizes = [1, 6, 4], strides = [1, 1, 1]} : vector<1x6x24xf32> to vector<1x6x4xf32>
    %9 = vector.extract_strided_slice %2 {offsets = [0, 0, 16], sizes = [1, 6, 4], strides = [1, 1, 1]} : vector<1x6x24xf32> to vector<1x6x4xf32>
    "tpu.trace_start"() <{level = 10 : i32, message = "bqd,bkd->bqk"}> : () -> ()
    %cst_4 = arith.constant dense<0.000000e+00> : vector<1x6x6xf32>
    %10 = tpu.matmul %7, %8, %cst_4 {dimension_numbers = #tpu.dot_dimension_numbers<[2], [2], [1], [1], [0, 0, 0, 1, 1, 1], [0], [0]>} : vector<1x6x4xf32>, vector<1x6x4xf32>, vector<1x6x6xf32> -> vector<1x6x6xf32>
    %cst_5 = arith.constant 0xFF800000 : f32
    "tpu.trace_stop"() : () -> ()
    %11 = vector.broadcast %cst_5 : f32 to vector<1x6x6xf32>
    %12 = arith.select %6, %10, %11 : vector<1x6x6xi1>, vector<1x6x6xf32>
    %cst_6 = arith.constant dense<0xFF800000> : vector<1x6xf32>
    %13 = vector.multi_reduction <maximumf>, %12, %cst_6 [2] : vector<1x6x6xf32> to vector<1x6xf32>
    %14 = vector.shape_cast %13 : vector<1x6xf32> to vector<1x6x1xf32>
    %15 = vector.broadcast %14 : vector<1x6x1xf32> to vector<1x6x6xf32>
    %16 = arith.subf %12, %15 : vector<1x6x6xf32>
    %17 = math.exp %16 : vector<1x6x6xf32>
    %cst_7 = arith.constant dense<0.000000e+00> : vector<1x6xf32>
    %18 = vector.multi_reduction <add>, %17, %cst_7 [2] : vector<1x6x6xf32> to vector<1x6xf32>
    %19 = vector.shape_cast %18 : vector<1x6xf32> to vector<1x6x1xf32>
    %20 = tpu.reciprocal %19 {approx = true} : vector<1x6x1xf32> -> vector<1x6x1xf32>
    %21 = vector.broadcast %20 : vector<1x6x1xf32> to vector<1x6x6xf32>
    %22 = arith.mulf %17, %21 : vector<1x6x6xf32>
    "tpu.trace_start"() <{level = 10 : i32, message = "bqk,bkd->bqd"}> : () -> ()
    %cst_8 = arith.constant dense<0.000000e+00> : vector<1x6x4xf32>
    %23 = tpu.matmul %22, %9, %cst_8 {dimension_numbers = #tpu.dot_dimension_numbers<[2], [1], [1], [2], [0, 0, 0, 1, 1, 2], [0], [0]>} : vector<1x6x6xf32>, vector<1x6x4xf32>, vector<1x6x4xf32> -> vector<1x6x4xf32>
    "tpu.trace_stop"() : () -> ()
    %c0_9 = arith.constant 0 : index
    %c0_10 = arith.constant 0 : index
    %c0_11 = arith.constant 0 : index
    %24 = vector.load %arg3[%c0_9, %c0_10, %c0_11] : memref<1x6x8xf32, #tpu.memory_space<vmem>>, vector<1x6x4xf32>
    tpu.vector_store %arg3[%c0_9, %c0_10, %c0_11], %23 {strides = array<i32>} : memref<1x6x8xf32, #tpu.memory_space<vmem>>, vector<1x6x4xf32>,
    %25 = vector.extract_strided_slice %2 {offsets = [0, 0, 4], sizes = [1, 6, 4], strides = [1, 1, 1]} : vector<1x6x24xf32> to vector<1x6x4xf32>
    %26 = vector.extract_strided_slice %2 {offsets = [0, 0, 12], sizes = [1, 6, 4], strides = [1, 1, 1]} : vector<1x6x24xf32> to vector<1x6x4xf32>
    %27 = vector.extract_strided_slice %2 {offsets = [0, 0, 20], sizes = [1, 6, 4], strides = [1, 1, 1]} : vector<1x6x24xf32> to vector<1x6x4xf32>
    "tpu.trace_start"() <{level = 10 : i32, message = "bqd,bkd->bqk"}> : () -> ()
    %cst_12 = arith.constant dense<0.000000e+00> : vector<1x6x6xf32>
    %28 = tpu.matmul %25, %26, %cst_12 {dimension_numbers = #tpu.dot_dimension_numbers<[2], [2], [1], [1], [0, 0, 0, 1, 1, 1], [0], [0]>} : vector<1x6x4xf32>, vector<1x6x4xf32>, vector<1x6x6xf32> -> vector<1x6x6xf32>
    %cst_13 = arith.constant 0xFF800000 : f32
    "tpu.trace_stop"() : () -> ()
    %29 = vector.broadcast %cst_13 : f32 to vector<1x6x6xf32>
    %30 = arith.select %6, %28, %29 : vector<1x6x6xi1>, vector<1x6x6xf32>
    %cst_14 = arith.constant dense<0xFF800000> : vector<1x6xf32>
    %31 = vector.multi_reduction <maximumf>, %30, %cst_14 [2] : vector<1x6x6xf32> to vector<1x6xf32>
    %32 = vector.shape_cast %31 : vector<1x6xf32> to vector<1x6x1xf32>
    %33 = vector.broadcast %32 : vector<1x6x1xf32> to vector<1x6x6xf32>
    %34 = arith.subf %30, %33 : vector<1x6x6xf32>
    %35 = math.exp %34 : vector<1x6x6xf32>
    %cst_15 = arith.constant dense<0.000000e+00> : vector<1x6xf32>
    %36 = vector.multi_reduction <add>, %35, %cst_15 [2] : vector<1x6x6xf32> to vector<1x6xf32>
    %37 = vector.shape_cast %36 : vector<1x6xf32> to vector<1x6x1xf32>
    %38 = tpu.reciprocal %37 {approx = true} : vector<1x6x1xf32> -> vector<1x6x1xf32>
    %39 = vector.broadcast %38 : vector<1x6x1xf32> to vector<1x6x6xf32>
    %40 = arith.mulf %35, %39 : vector<1x6x6xf32>
    "tpu.trace_start"() <{level = 10 : i32, message = "bqk,bkd->bqd"}> : () -> ()
    %cst_16 = arith.constant dense<0.000000e+00> : vector<1x6x4xf32>
    %41 = tpu.matmul %40, %27, %cst_16 {dimension_numbers = #tpu.dot_dimension_numbers<[2], [1], [1], [2], [0, 0, 0, 1, 1, 2], [0], [0]>} : vector<1x6x6xf32>, vector<1x6x4xf32>, vector<1x6x4xf32> -> vector<1x6x4xf32>
    "tpu.trace_stop"() : () -> ()
    %c0_17 = arith.constant 0 : index
    %c0_18 = arith.constant 0 : index
    %c4 = arith.constant 4 : index
    %42 = vector.load %arg3[%c0_17, %c0_18, %c4] : memref<1x6x8xf32, #tpu.memory_space<vmem>>, vector<1x6x4xf32>
    tpu.vector_store %arg3[%c0_17, %c0_18, %c4], %41 {strides = array<i32>} : memref<1x6x8xf32, #tpu.memory_space<vmem>>, vector<1x6x4xf32>,
    return
  }
  func.func @transform_0(%arg0: i32) -> (i32, i32, i32) {
    %c0_i32 = arith.constant 0 : i32
    %c0_i32_0 = arith.constant 0 : i32
    %c0_i32_1 = arith.constant 0 : i32
    return %arg0, %c0_i32, %c0_i32_0 : i32, i32, i32
  }
  func.func @transform_1(%arg0: i32) -> (i32, i32) {
    %c0_i32 = arith.constant 0 : i32
    %c0_i32_0 = arith.constant 0 : i32
    %c0_i32_1 = arith.constant 0 : i32
    return %c0_i32, %c0_i32_0 : i32, i32
  }
  func.func @transform_2(%arg0: i32) -> (i32, i32, i32) {
    %c0_i32 = arith.constant 0 : i32
    %c0_i32_0 = arith.constant 0 : i32
    %c0_i32_1 = arith.constant 0 : i32
    return %arg0, %c0_i32, %c0_i32_0 : i32, i32, i32
  }
}

</mosaic_0001>

<bundles_post_ra>
// kernel: tpu_custom_call.1
= control target key start
LH: loop header
LB: loop body
LE: loop exit
PB: predicated region body
PF: predicated region fallthrough
CT: control target
= control target key end

     0   :  { %s731_s9 = smov 0   ;;  %s777_s0 = inlined_call_operand.vmem [shape: f32[2,6,3], index: 0, kind: input, shape index: {}]   ;;  %s778_s1 = inlined_call_operand.vmem [shape: f32[3,24], index: 1, kind: input, shape index: {}]   ;;  %s779_s2 = inlined_call_operand.vmem [shape: f32[2,6,8], index: 2, kind: output, shape index: {}]  }
   0x1 LB: > { %s622_s10 = sadd.s32 4294967295, %s706_s9   ;;  %p626_p0 = scmp.ge.s32.totalorder %s706_s9, 1  ;;  %s706_s9 = sphi %s731_s9, %s12_s9  }
   0x2   : > { %p111_p1 = scmp.lt.s32.totalorder %s706_s9, 3 }
   0x4   : > { %p112_p2 = pnand %p626_p0, %p111_p1 }
   0x5   : > { %v140_v0 = vld [vmem:[%s778_s1] sm:$0x7] (!%p112_p2)  ;;  %vm145_vm0 = vcmask (!%p112_p2), 1042432   ;;  %p131_p3 = scmp.lt.s32.totalorder (!%p112_p2), %s622_s10, 1  ;;  %v708_v1 = vmov (!%p112_p2), 0.0   ;;  %vm709_vm1 = vmmov (!%p112_p2), 0   ;;  %v219_v8 = vlaneseq (!%p112_p2) }
   0x6   : > { %115 = sbr.rel (%p112_p2) target bundleno = 1206 (0x4b6), region = 28  ;;  %651 = vmatprep.subr.mxu0 (!%p112_p2), %v708_v1  ;;  %653 = vmatprep.mubr.msk.f32.mxu0 (!%p112_p2), %vm709_vm1, %v708_v1  ;;  %vm141_vm2 = vcmask (!%p112_p2), 23552   ;;  %s710_s17 = smov (!%p112_p2), 124   ;;  %vm227_vm3 = vcmask (!%p112_p2), 31744   ;;  %vm303_vm5 = vcmask (!%p112_p2), 46080   ;;  %vm321_vm6 = vcmask (!%p112_p2), 1045504  }
   0x7   : > { %652 = vmatpush3.msk.msra.mxu0 (!%p112_p2), %vm145_vm0, %v140_v0  ;;  %656 = vmatprep.subr.mxu1 (!%p112_p2), %v708_v1  ;;  %s711_s18 = smov (!%p112_p2), 120   ;;  %s712_s19 = smov (!%p112_p2), 116   ;;  %v220_v9 = vshrl.u32 (!%p112_p2), %v219_v8, 7  ;;  %v222_v10 = vand.u32 (!%p112_p2), 127, %v219_v8  ;;  %vm317_vm7 = vcmask (!%p112_p2), 48128   ;;  %vm394_vm8 = vcmask (!%p112_p2), 29696  }
   0x8   : > { %658 = vmatprep.mubr.msk.f32.mxu1 (!%p112_p2), %vm709_vm1, %v708_v1  ;;  %661 = vmatprep.subr.mxu0 (!%p112_p2), %v708_v1  ;;  %s713_s20 = smov (!%p112_p2), 108   ;;  %s714_s21 = smov (!%p112_p2), 112   ;;  %vm567_vm9 = vcmask (!%p112_p2), 62496  }
   0x9   : > { %vm223_vm4 = vcmp.ge.s32.totalorder (!%p112_p2), %v220_v9, %v222_v10  ;;  %s715_s25 = smov (!%p112_p2), 4  }
   0xd   : > { %s781_s10 = smov (!%p131_p3, %s622_s10), 1 }
   0xe   : > { %s627_s13 = sshll.u32 %s781_s10, 3 }
   0xf   : > { %s134_s16 = scalar_lea.vmem %s777_s0, %s627_s13  ;;  %s138_s24 = scalar_lea.vmem %s779_s2, %s627_s13 }
  0x10   : > { %v139_v2 = vld [vmem:[%s134_s16] sm:$0x3f] }
  0x11   : > { %654 = vmatmul.mubr.msk.f32.vlgmr.msra.gmra.mrb[0].mxu0 %vm141_vm2, %v139_v2 }
  0x12   : > { %663 = vmatprep.mubr.msk.f32.mxu0 %vm709_vm1, %v708_v1 }
  0xe4   : > { %v215_v3 = vpop.f32.mrb[0].mxu0 }
  0xe5   : > { %396 = vrot.lane.b32.xlu1 %v215_v3, %s710_s17  ;;  %225 = vrot.lane.b32.xlu0 %v215_v3, %s711_s18  ;;  %v655_v4 = vpop.f32.mrb[1].mxu0 }
  0xe9   : > { %398 = vrot.lane.b32.xlu0 %v215_v3, %s712_s19 }
 0x157   : > { %v226_v5 = vpop.permute.xlu0 %225  ;;  %v397_v7 = vpop.permute.xlu1 %396 }
 0x158   : > { %657 = vmatpush3.xpose.msk.msra.mxu1 %vm227_vm3, %v226_v5 }
 0x159   : > { %666 = vmatprep.subr.mxu1 %v708_v1 }
 0x15b   : > { %659 = vmatmul.mubr.msk.f32.vlgmr.msra.gmra.mrb[0].mxu1 %vm227_vm3, %v215_v3  ;;  %v399_v6 = vpop.permute.xlu0 %398 }
 0x15c   : > { %667 = vmatpush3.xpose.msk.msra.mxu1 %vm227_vm3, %v399_v6  ;;  %668 = vmatprep.mubr.msk.f32.mxu1 %vm709_vm1, %v708_v1 }
 0x15f   : > { %669 = vmatmul.mubr.msk.f32.vlgmr.msra.gmra.mrb[2].mxu1 %vm227_vm3, %v397_v7 }
 0x22e   : > { %v298_v11 = vpop.f32.mrb[0].mxu1 }
 0x22f   : > { %v302_v12 = vsel %vm223_vm4, %v298_v11, -inf  ;;  %v660_v13 = vpop.f32.mrb[1].mxu1 }
 0x230   : > { %v304_v14 = vsel %vm303_vm5, %v302_v12, -inf }
 0x231   : > { %305 = vmax.xlane.f32.xlu1 %v304_v14 }
 0x232   : > { %v470_v15 = vpop.f32.mrb[2].mxu1 }
 0x233   : > { %v474_v16 = vsel %vm223_vm4, %v470_v15, -inf  ;;  %v670_v17 = vpop.f32.mrb[3].mxu1 }
 0x234   : > { %v475_v18 = vsel %vm303_vm5, %v474_v16, -inf }
 0x235   : > { %476 = vmax.xlane.f32.xlu0 %v475_v18 }
 0x2be   : > { %v306_v19 = vpop.xlane.xlu1 %305 }
 0x2bf   : > { %v307_v20 = vsub.f32 %v302_v12, %v306_v19 }
 0x2c1   : > { %v308_v21 = vmul.f32 1.442695, %v307_v20 }
 0x2c2   : > { %v477_v22 = vpop.xlane.xlu0 %476 }
 0x2c3   : > { %692 = vpow2.f32 %v308_v21  ;;  %v478_v23 = vsub.f32 %v474_v16, %v477_v22 }
 0x2c5   : > { %v479_v24 = vmul.f32 1.442695, %v478_v23 }
 0x2c7   : > { %694 = vpow2.f32 %v479_v24 }
 0x2cd   : > { %v693_v25 = vpop.eup %692 }
 0x2ce   : > { %v310_v26 = vsel %vm303_vm5, %v693_v25, 0.0 }
 0x2cf   : > { %311 = vadd.xlane.f32.xlu0 %v310_v26 }
 0x2d1   : > { %v695_v27 = vpop.eup %694 }
 0x2d2   : > { %v481_v28 = vsel %vm303_vm5, %v695_v27, 0.0 }
 0x2d3   : > { %482 = vadd.xlane.f32.xlu1 %v481_v28 }
 0x2e4   : > { %486 = vrot.lane.b32.xlu1 %v215_v3, %s713_s20 }
 0x2e5   : > { %315 = vrot.lane.b32.xlu0 %v215_v3, %s714_s21 }
 0x35c   : > { %v312_v29 = vpop.xlane.xlu0 %311 }
 0x35d   : > { %696 = vrcp.f32 %v312_v29 }
 0x360   : > { %v483_v30 = vpop.xlane.xlu1 %482  ;;  %v316_v31 = vpop.permute.xlu0 %315 }
 0x361   : > { %698 = vrcp.f32 %v483_v30  ;;  %662 = vmatpush3.msk.msra.mxu0 %vm321_vm6, %v316_v31 }
 0x362   : > { %671 = vmatprep.subr.mxu0 %v708_v1 }
 0x364   : > { %v487_v34 = vpop.permute.xlu1 %486 }
 0x367   : > { %v697_v32 = vpop.eup %696 }
 0x368   : > { %v314_v33 = vmul.f32 %v697_v32, %v693_v25 }
 0x36a   : > { %664 = vmatmul.mubr.msk.f32.vlgmr.msra.gmra.mrb[2].mxu0 %vm317_vm7, %v314_v33 }
 0x36b   : > { %v699_v35 = vpop.eup %698  ;;  %672 = vmatpush3.msk.msra.mxu0 %vm321_vm6, %v487_v34  ;;  %673 = vmatprep.mubr.msk.f32.mxu0 %vm709_vm1, %v708_v1 }
 0x36c   : > { %v485_v36 = vmul.f32 %v699_v35, %v695_v27 }
 0x36e   : > { %674 = vmatmul.mubr.msk.f32.vlgmr.msra.gmra.mrb[4].mxu0 %vm317_vm7, %v485_v36 }
 0x43d   : > { %v390_v37 = vpop.f32.mrb[2].mxu0 }
 0x43e   : > { %395 = vst.msk [vmem:[%s138_s24] sm:$0x3f] %vm394_vm8, %v390_v37  ;;  %v665_v38 = vpop.f32.mrb[3].mxu0 }
 0x441   : > { %v559_v39 = vpop.f32.mrb[4].mxu0 }
 0x442   : > { %564 = vrot.lane.b32.xlu1 %v559_v39, %s715_s25  ;;  %v675_v40 = vpop.f32.mrb[5].mxu0 }
 0x4b4   : > { %v565_v41 = vpop.permute.xlu1 %564 }
 0x4b5   : > { %568 = vst.msk [vmem:[%s138_s24] sm:$0x3f] %vm567_vm9, %v565_v41 }
 0x4b6 PF: > { %s12_s9 = sadd.s32 1, %s706_s9  }
 0x4b7   : > { %p9_p4 = scmp.ge.s32.totalorder %s12_s9, 4  }
 0x4b9   :  { %11 = sbr.rel (!%p9_p4) target bundleno = 1 (0x1), region = 58 }

</bundles_post_ra>
